<compile_context>
chip_gen: v5e
topology: v5e:2x2
jax: 0.10.0
libtpu: 0.0.40
codegen_flags: <defaults>
</compile_context>

<pallas_src>
import numpy as np

import jax
import jax.numpy as jnp
from jax import lax
from jax.experimental import pallas as pl
from jax.experimental.pallas import tpu as pltpu

_NORM_EPS = 1e-12
_LANE = 128
_SUBLANE = 8


def _round_up(x, m):
    return (x + m - 1) // m * m


def _vmem_capacity_bytes():
    try:
        return int(pltpu.get_tpu_info().vmem_capacity_bytes)
    except Exception:
        return 64 * 1024 * 1024        # conservative fallback: assume v7x


def _weight_tile_budget(vmem_bytes):
    # Per-buffer weight budget (pipeline double-buffers it):
    #   128 MiB VMEM parts (v5e / v6e) -> 20 MiB; 64 MiB parts (v7x) -> 8 MiB.
    if vmem_bytes >= 100 * 1024 * 1024:
        return 20 * 1024 * 1024
    return 8 * 1024 * 1024


def _choose_tk(k_pad, n_pad, itemsize, budget):
    """K tile: whole (padded) reduction dim if the weight fits the per-buffer
    budget, else the largest multiple of 128 under budget, preferring an exact
    divisor of k_pad so no extra zero rows of W are streamed."""
    if k_pad * n_pad * itemsize <= budget:
        return k_pad
    cap = max(_LANE, (budget // (n_pad * itemsize)) // _LANE * _LANE)
    tk = cap
    while tk >= _LANE and k_pad % tk != 0:
        tk -= _LANE
    if tk >= cap // 2:
        return tk
    return cap                      # caller pads dim_in up to a multiple of cap


def _make_kernel(nk):
    if nk == 1:
        # Single-step fast path: no zero-init, no read-modify-write of o_ref.
        def kernel(x_ref, w_ref, b_ref, o_ref):
            y = jnp.dot(x_ref[...], w_ref[...], preferred_element_type=jnp.float32)
            y = y + b_ref[...]
            sumsq = jnp.sum(y * y, axis=1, keepdims=True)
            o_ref[...] = y * lax.rsqrt(sumsq + _NORM_EPS)
        return kernel

    def kernel(x_ref, w_ref, b_ref, o_ref):
        k = pl.program_id(1)

        @pl.when(k == 0)
        def _():
            # Fold the bias into the accumulator init (no epilogue add).
            o_ref[...] = jnp.broadcast_to(b_ref[...], o_ref.shape)

        o_ref[...] += jnp.dot(x_ref[...], w_ref[...],
                              preferred_element_type=jnp.float32)

        @pl.when(k == nk - 1)
        def _():
            y = o_ref[...]
            sumsq = jnp.sum(y * y, axis=1, keepdims=True)
            o_ref[...] = y * lax.rsqrt(sumsq + _NORM_EPS)   # EUP rsqrt, eps-guarded

    return kernel


def embed_forward_batched(x_list, weight, bias, *, tk=None, tm=None):
    """Apply Embed (flatten -> Linear -> L2 norm) to several inputs with ONE
    pallas_call.

    x_list : list of arrays, each (B_i, ...) with prod(...) == dim_in
    weight : (dim_in, dim_out)  -- transposed vs. torch nn.Linear.weight;
             stream dtype == weight.dtype (convert to bf16 ONCE outside if wanted)
    bias   : (dim_out,)
    Returns: list of (B_i, dim_out) arrays (float32, or the input dtype if not f32).
    """
    dim_in, dim_out = weight.shape
    itemsize = np.dtype(weight.dtype).itemsize

    flats, in_dtypes, sizes = [], [], []
    for x in x_list:
        x2 = x.reshape(x.shape[0], -1)
        assert x2.shape[1] == dim_in, (x2.shape, dim_in)
        flats.append(x2)
        in_dtypes.append(x.dtype)
        sizes.append(x2.shape[0])
    x_all = jnp.concatenate(flats, axis=0) if len(flats) > 1 else flats[0]
    if x_all.dtype != weight.dtype:
        x_all = x_all.astype(weight.dtype)      # x is tiny; match MXU operand dtype
    R = x_all.shape[0]

    # ---- padding / tiling -------------------------------------------------
    vmem_cap = _vmem_capacity_bytes()
    budget = _weight_tile_budget(vmem_cap)

    n_pad = _round_up(dim_out, _LANE)
    k_pad = _round_up(dim_in, _LANE)
    if tk is None:
        tk = _choose_tk(k_pad, n_pad, itemsize, budget)
    else:
        tk = _round_up(tk, _LANE)
    k_pad = _round_up(k_pad, tk)
    nk = k_pad // tk

    if tm is None:
        tm = _round_up(R, _SUBLANE) if R <= 512 else 256
    else:
        tm = _round_up(tm, _SUBLANE)
    r_pad = _round_up(R, tm)
    nr = r_pad // tm

    # Zero-pad (zero rows/cols of x and W do not change y or the L2 norm).
    w_use = weight
    if (k_pad, n_pad) != (dim_in, dim_out):
        w_use = jnp.pad(weight, ((0, k_pad - dim_in), (0, n_pad - dim_out)))
    b_use = bias.astype(jnp.float32)
    if n_pad != dim_out:
        b_use = jnp.pad(b_use, (0, n_pad - dim_out))
    b_use = b_use.reshape(1, n_pad)
    x_use = x_all
    if (r_pad, k_pad) != (R, dim_in):
        x_use = jnp.pad(x_all, ((0, r_pad - R), (0, k_pad - dim_in)))

    # ---- VMEM limit from actual need (double-buffered inputs/outputs) -----
    need = (2 * tm * tk * itemsize          # x
            + 2 * tk * n_pad * itemsize     # weight (dominant)
            + 2 * n_pad * 4                 # bias
            + 2 * tm * n_pad * 4)           # f32 output / accumulator
    vmem_limit = int(min(max(need * 1.25 + (4 << 20), 32 << 20), 0.9 * vmem_cap))

    cost = pl.CostEstimate(
        flops=2 * r_pad * k_pad * n_pad,
        transcendentals=r_pad,
        bytes_accessed=(r_pad * k_pad * itemsize
                        + nr * k_pad * n_pad * itemsize
                        + n_pad * 4
                        + r_pad * n_pad * 4),
    )

    out = pl.pallas_call(
        _make_kernel(nk),
        out_shape=jax.ShapeDtypeStruct((r_pad, n_pad), jnp.float32),
        grid_spec=pltpu.PrefetchScalarGridSpec(
            num_scalar_prefetch=0,
            grid=(nr, nk),                                        # rows, then K
            in_specs=[
                pl.BlockSpec((tm, tk), lambda r, k: (r, k)),      # x tile
                pl.BlockSpec((tk, n_pad), lambda r, k: (k, 0)),   # weight stream
                pl.BlockSpec((1, n_pad), lambda r, k: (0, 0)),    # bias (resident)
            ],
            out_specs=pl.BlockSpec((tm, n_pad), lambda r, k: (r, 0)),  # f32 acc
        ),
        compiler_params=pltpu.CompilerParams(
            dimension_semantics=("parallel", "arbitrary"),        # rows ∥, K reduce
            vmem_limit_bytes=vmem_limit,
        ),
        cost_estimate=cost,
    )(x_use, w_use, b_use)

    out = out[:R, :dim_out]

    # split back per input, restoring dtype when the input was not f32
    results, off = [], 0
    for b, dt in zip(sizes, in_dtypes):
        chunk = out[off:off + b]
        results.append(chunk if dt == jnp.float32 else chunk.astype(dt))
        off += b
    return results


def embed_forward(x, weight, bias, **kw):
    """Single-input convenience wrapper (one Embed application)."""
    return embed_forward_batched([x], weight, bias, **kw)[0]


def _reference(x, weight, bias):
    y = x.reshape(x.shape[0], -1).astype(jnp.float32) @ weight.astype(jnp.float32)
    y = y + bias.astype(jnp.float32)
    return y / jnp.sqrt(jnp.sum(y * y, axis=1, keepdims=True))


if __name__ == "__main__":
    # Module defaults: dim_in=1024, dim_out=128.  B=2, C=4, H=W=16 -> dim_in=1024.
    B, C, H, W = 2, 4, 16, 16
    dim_in = C * H * W
    dim_out = 128
    n_apps = 3                      # batch several Embed applications per call

    key = jax.random.PRNGKey(0)
    kw_, kb_, *kxs = jax.random.split(key, 2 + n_apps)

    bound = 1.0 / np.sqrt(dim_in)   # torch nn.Linear-like init scale
    weight = jax.random.uniform(kw_, (dim_in, dim_out), jnp.float32, -bound, bound)
    bias = jax.random.uniform(kb_, (dim_out,), jnp.float32, -bound, bound)
    xs = [jax.random.normal(k, (B, C, H, W), dtype=jnp.float32) for k in kxs]

    refs = [np.asarray(_reference(x, weight, bias)) for x in xs]

    # 1) f32, batched, auto tile (whole weight in one K tile -> fast path)
    outs = jax.block_until_ready(embed_forward_batched(xs, weight, bias))
    for o, r in zip(outs, refs):
        np.testing.assert_allclose(np.asarray(o), r, rtol=1e-5, atol=1e-5)

    # 2) f32, forced small K tile (exercises the multi-step accumulation path)
    outs_t = jax.block_until_ready(embed_forward_batched(xs, weight, bias, tk=256))
    for o, r in zip(outs_t, refs):
        np.testing.assert_allclose(np.asarray(o), r, rtol=1e-5, atol=1e-5)

    # 3) bf16 weight streaming: convert ONCE (persistent), reuse across calls —
    #    no hidden per-call f32->bf16 copy inflating HBM traffic.
    weight_bf16 = jax.block_until_ready(weight.astype(jnp.bfloat16))
    bias_f32 = bias                                   # bias stays f32 (512 B)
    outs_b = jax.block_until_ready(
        embed_forward_batched(xs, weight_bf16, bias_f32, tk=256))
    for o, r in zip(outs_b, refs):
        np.testing.assert_allclose(np.asarray(o), r, rtol=2e-2, atol=2e-2)

    # 4) single-input convenience path
    out1 = jax.block_until_ready(embed_forward(xs[0], weight, bias))
    np.testing.assert_allclose(np.asarray(out1), refs[0], rtol=1e-5, atol=1e-5)

    print("KERNEL_OK")
</pallas_src>

<mosaic_0001>
module attributes {stable_mosaic.version = 11 : i64} {
  func.func @kernel(%arg0: i32, %arg1: i32, %arg2: memref<8x1024xf32, #tpu.memory_space<vmem>>, %arg3: memref<1024x128xf32, #tpu.memory_space<vmem>>, %arg4: memref<1x128xf32, #tpu.memory_space<vmem>>, %arg5: memref<8x128xf32, #tpu.memory_space<vmem>>) attributes {dimension_semantics = [#tpu.dimension_semantics<parallel>, #tpu.dimension_semantics<arbitrary>], iteration_bounds = array<i64: 1, 1>, scalar_prefetch = 0 : i64, scratch_operands = 0 : i64, tpu.core_type = #tpu.core_type<tc>, window_params = [{transform_indices = @transform_0, window_bounds = array<i64: 8, 1024>}, {transform_indices = @transform_1, window_bounds = array<i64: 1024, 128>}, {pipeline_mode = #tpu.pipeline_mode<synchronous>, transform_indices = @transform_2, window_bounds = array<i64: 1, 128>}, {transform_indices = @transform_3, window_bounds = array<i64: 8, 128>}]} {
    %c0 = arith.constant 0 : index
    %c0_0 = arith.constant 0 : index
    %0 = vector.load %arg2[%c0, %c0_0] : memref<8x1024xf32, #tpu.memory_space<vmem>>, vector<8x1024xf32>
    %c0_1 = arith.constant 0 : index
    %c0_2 = arith.constant 0 : index
    %1 = vector.load %arg3[%c0_1, %c0_2] : memref<1024x128xf32, #tpu.memory_space<vmem>>, vector<1024x128xf32>
    %cst = arith.constant dense<0.000000e+00> : vector<8x128xf32>
    %2 = tpu.matmul %0, %1, %cst {dimension_numbers = #tpu.dot_dimension_numbers<[1], [0], [0], [1], [0, 0, 1, 1], [], []>} : vector<8x1024xf32>, vector<1024x128xf32>, vector<8x128xf32> -> vector<8x128xf32>
    %c0_3 = arith.constant 0 : index
    %c0_4 = arith.constant 0 : index
    %3 = vector.load %arg4[%c0_3, %c0_4] : memref<1x128xf32, #tpu.memory_space<vmem>>, vector<1x128xf32>
    %4 = vector.broadcast %3 : vector<1x128xf32> to vector<8x128xf32>
    %5 = arith.addf %2, %4 : vector<8x128xf32>
    %6 = arith.mulf %5, %5 : vector<8x128xf32>
    %cst_5 = arith.constant dense<0.000000e+00> : vector<8xf32>
    %7 = vector.multi_reduction <add>, %6, %cst_5 [1] : vector<8x128xf32> to vector<8xf32>
    %8 = vector.shape_cast %7 : vector<8xf32> to vector<8x1xf32>
    %cst_6 = arith.constant 9.99999996E-13 : f32
    %9 = vector.broadcast %cst_6 : f32 to vector<8x1xf32>
    %10 = arith.addf %8, %9 : vector<8x1xf32>
    %11 = math.rsqrt %10 : vector<8x1xf32>
    %12 = vector.broadcast %11 : vector<8x1xf32> to vector<8x128xf32>
    %13 = arith.mulf %5, %12 : vector<8x128xf32>
    %c0_7 = arith.constant 0 : index
    %c0_8 = arith.constant 0 : index
    %14 = vector.load %arg5[%c0_7, %c0_8] : memref<8x128xf32, #tpu.memory_space<vmem>>, vector<8x128xf32>
    tpu.vector_store %arg5[%c0_7, %c0_8], %13 {strides = array<i32>} : memref<8x128xf32, #tpu.memory_space<vmem>>, vector<8x128xf32>,
    return
  }
  func.func @transform_0(%arg0: i32, %arg1: i32) -> (i32, i32) {
    %c0_i32 = arith.constant 0 : i32
    return %arg0, %arg1 : i32, i32
  }
  func.func @transform_1(%arg0: i32, %arg1: i32) -> (i32, i32) {
    %c0_i32 = arith.constant 0 : i32
    %c0_i32_0 = arith.constant 0 : i32
    return %arg1, %c0_i32 : i32, i32
  }
  func.func @transform_2(%arg0: i32, %arg1: i32) -> (i32, i32) {
    %c0_i32 = arith.constant 0 : i32
    %c0_i32_0 = arith.constant 0 : i32
    %c0_i32_1 = arith.constant 0 : i32
    return %c0_i32, %c0_i32_0 : i32, i32
  }
  func.func @transform_3(%arg0: i32, %arg1: i32) -> (i32, i32) {
    %c0_i32 = arith.constant 0 : i32
    %c0_i32_0 = arith.constant 0 : i32
    return %arg0, %c0_i32 : i32, i32
  }
}

</mosaic_0001>

<bundles_post_ra>
// kernel: tpu_custom_call.1
= control target key start
LH: loop header
LB: loop body
LE: loop exit
PB: predicated region body
PF: predicated region fallthrough
CT: control target
= control target key end

     0   :  { %8 = vsyncpa [#allocation3], 0  ;;  %s502_s0 = inlined_call_operand.hbm [shape: f32[8,1024], index: 0, kind: input, shape index: {}]   ;;  %s503_s1 = inlined_call_operand.hbm [shape: f32[1024,128], index: 1, kind: input, shape index: {}]   ;;  %s504_s2 = inlined_call_operand.vmem [shape: f32[1,128], index: 2, kind: input, shape index: {}]   ;;  %s505_s3 = inlined_call_operand.hbm [shape: f32[8,128], index: 3, kind: output, shape index: {}]  }
   0x1   :  { %9 = vsyncpa [#allocation6], 0 }
   0x2   :  { %10 = vsyncpa [#allocation4], 0  ;;  %s16_s14 = sshll.u32 %s502_s0, 4  ;;  %s465_s15 = smov [#allocation2]   ;;  %s17_s14 = int_to_ptr.hbm [resolvable:$true] %s16_s14 }
   0x3   :  { %s18_s16 = sshll.u32 %s465_s15, 4  ;;  %s26_s19 = sshll.u32 %s503_s1, 4  ;;  %s19_s16 = int_to_ptr.vmem [resolvable:$true] %s18_s16  ;;  %s27_s19 = int_to_ptr.hbm [resolvable:$true] %s26_s19 }
   0x4   :  { %21 = dma.hbm_to_vmem [thread:$0]  %s17_s14, 1024, %s19_s16, [#allocation3]  }
   0x5   :  { %s466_s20 = smov [#allocation5]   ;;  %s467_s22 = smov 128  }
   0x6   :  { %s28_s21 = sshll.u32 %s466_s20, 4  ;;  %s468_s23 = smov 8   ;;  %s29_s21 = int_to_ptr.vmem [resolvable:$true] %s28_s21 }
   0x7   :  { %34 = dma.hbm_to_vmem [thread:$0]  %s27_s19, 16384, %s29_s21, [#allocation6], %s467_s22, %s467_s22, %s468_s23  }
   0x8   :  { %459 = dma.done.wait [#allocation3], 1024  }
   0x9   :  { %460 = vsyncadd [#allocation3], 4294966272 }
   0xa   :  { %461 = dma.done.wait [#allocation6], 16384  }
   0xb   :  { %462 = vsyncadd [#allocation6], 4294950912  ;;  %v100_v0 = vld [vmem:[#allocation5 + $0x178] sm:$0xff]  ;;  %v99_v2 = vld [vmem:[#allocation5 + $0x170] sm:$0xff]  ;;  %s368_s27 = sshll.u32 %s505_s3, 4  ;;  %s369_s27 = int_to_ptr.hbm [resolvable:$true] %s368_s27 }
   0xc   :  { %v68_v1 = vld [vmem:[#allocation5 + $0x78] sm:$0xff]  ;;  %225 = vmatpush.msra.mxu2 %v100_v0  ;;  %v67_v4 = vld [vmem:[#allocation5 + $0x70] sm:$0xff]  ;;  %v98_v6 = vld [vmem:[#allocation5 + $0x168] sm:$0xff] }
   0xd   :  { %185 = vmatpush.msra.mxu0 %v68_v1  ;;  %v116_v3 = vld [vmem:[#allocation5 + $0x1f8] sm:$0xff]  ;;  %v115_v7 = vld [vmem:[#allocation5 + $0x1f0] sm:$0xff]  ;;  %v66_v8 = vld [vmem:[#allocation5 + $0x68] sm:$0xff] }
   0xe   :  { %v84_v5 = vld [vmem:[#allocation5 + $0xf8] sm:$0xff]  ;;  %245 = vmatpush.msra.mxu3 %v116_v3  ;;  %226 = vmatpush.msra.mxu2 %v99_v2  ;;  %v83_v9 = vld [vmem:[#allocation5 + $0xf0] sm:$0xff]  ;;  %v114_v10 = vld [vmem:[#allocation5 + $0x1e8] sm:$0xff] }
   0xf   :  { %205 = vmatpush.msra.mxu1 %v84_v5  ;;  %186 = vmatpush.msra.mxu0 %v67_v4  ;;  %v97_v11 = vld [vmem:[#allocation5 + $0x160] sm:$0xff]  ;;  %v82_v13 = vld [vmem:[#allocation5 + $0xe8] sm:$0xff]  ;;  %v96_v16 = vld [vmem:[#allocation5 + $0x158] sm:$0xff] }
  0x10   :  { %246 = vmatpush.msra.mxu3 %v115_v7  ;;  %v65_v12 = vld [vmem:[#allocation5 + $0x60] sm:$0xff]  ;;  %227 = vmatpush.msra.mxu2 %v98_v6  ;;  %v64_v17 = vld [vmem:[#allocation5 + $0x58] sm:$0xff]  ;;  %v95_v20 = vld [vmem:[#allocation5 + $0x150] sm:$0xff] }
  0x11   :  { %206 = vmatpush.msra.mxu1 %v83_v9  ;;  %187 = vmatpush.msra.mxu0 %v66_v8  ;;  %v113_v14 = vld [vmem:[#allocation5 + $0x1e0] sm:$0xff]  ;;  %v112_v18 = vld [vmem:[#allocation5 + $0x1d8] sm:$0xff]  ;;  %v63_v21 = vld [vmem:[#allocation5 + $0x50] sm:$0xff] }
  0x12   :  { %v81_v15 = vld [vmem:[#allocation5 + $0xe0] sm:$0xff]  ;;  %247 = vmatpush.msra.mxu3 %v114_v10  ;;  %228 = vmatpush.msra.mxu2 %v97_v11  ;;  %v80_v19 = vld [vmem:[#allocation5 + $0xd8] sm:$0xff]  ;;  %v111_v22 = vld [vmem:[#allocation5 + $0x1d0] sm:$0xff] }
  0x13   :  { %207 = vmatpush.msra.mxu1 %v82_v13  ;;  %188 = vmatpush.msra.mxu0 %v65_v12  ;;  %v79_v23 = vld [vmem:[#allocation5 + $0xd0] sm:$0xff]  ;;  %v94_v24 = vld [vmem:[#allocation5 + $0x148] sm:$0xff]  ;;  %v93_v28 = vld [vmem:[#allocation5 + $0x140] sm:$0xff] }
  0x14   :  { %248 = vmatpush.msra.mxu3 %v113_v14  ;;  %229 = vmatpush.msra.mxu2 %v96_v16  ;;  %v62_v25 = vld [vmem:[#allocation5 + $0x48] sm:$0xff]  ;;  %v61_v29 = vld [vmem:[#allocation5 + $0x40] sm:$0xff]  ;;  %v92_v32 = vld [vmem:[#allocation5 + $0x138] sm:$0xff] }
  0x15   :  { %208 = vmatpush.msra.mxu1 %v81_v15  ;;  %189 = vmatpush.msra.mxu0 %v64_v17  ;;  %v110_v26 = vld [vmem:[#allocation5 + $0x1c8] sm:$0xff]  ;;  %v109_v30 = vld [vmem:[#allocation5 + $0x1c0] sm:$0xff]  ;;  %v60_v33 = vld [vmem:[#allocation5 + $0x38] sm:$0xff] }
  0x16   :  { %249 = vmatpush.msra.mxu3 %v112_v18  ;;  %230 = vmatpush.msra.mxu2 %v95_v20  ;;  %v78_v27 = vld [vmem:[#allocation5 + $0xc8] sm:$0xff]  ;;  %v77_v31 = vld [vmem:[#allocation5 + $0xc0] sm:$0xff]  ;;  %v108_v34 = vld [vmem:[#allocation5 + $0x1b8] sm:$0xff] }
  0x17   :  { %209 = vmatpush.msra.mxu1 %v80_v19  ;;  %190 = vmatpush.msra.mxu0 %v63_v21  ;;  %v76_v35 = vld [vmem:[#allocation5 + $0xb8] sm:$0xff]  ;;  %v91_v36 = vld [vmem:[#allocation5 + $0x130] sm:$0xff]  ;;  %v90_v40 = vld [vmem:[#allocation5 + $0x128] sm:$0xff] }
  0x18   :  { %250 = vmatpush.msra.mxu3 %v111_v22  ;;  %231 = vmatpush.msra.mxu2 %v94_v24  ;;  %v59_v37 = vld [vmem:[#allocation5 + $0x30] sm:$0xff]  ;;  %v58_v41 = vld [vmem:[#allocation5 + $0x28] sm:$0xff]  ;;  %v89_v44 = vld [vmem:[#allocation5 + $0x120] sm:$0xff] }
  0x19   :  { %210 = vmatpush.msra.mxu1 %v79_v23  ;;  %191 = vmatpush.msra.mxu0 %v62_v25  ;;  %v107_v38 = vld [vmem:[#allocation5 + $0x1b0] sm:$0xff]  ;;  %v106_v42 = vld [vmem:[#allocation5 + $0x1a8] sm:$0xff]  ;;  %v57_v45 = vld [vmem:[#allocation5 + $0x20] sm:$0xff] }
  0x1a   :  { %251 = vmatpush.msra.mxu3 %v110_v26  ;;  %232 = vmatpush.msra.mxu2 %v93_v28  ;;  %v75_v39 = vld [vmem:[#allocation5 + $0xb0] sm:$0xff]  ;;  %v74_v43 = vld [vmem:[#allocation5 + $0xa8] sm:$0xff]  ;;  %v105_v46 = vld [vmem:[#allocation5 + $0x1a0] sm:$0xff] }
  0x1b   :  { %211 = vmatpush.msra.mxu1 %v78_v27  ;;  %192 = vmatpush.msra.mxu0 %v61_v29  ;;  %v73_v47 = vld [vmem:[#allocation5 + $0xa0] sm:$0xff]  ;;  %v88_v48 = vld [vmem:[#allocation5 + $0x118] sm:$0xff]  ;;  %v87_v52 = vld [vmem:[#allocation5 + $0x110] sm:$0xff] }
  0x1c   :  { %252 = vmatpush.msra.mxu3 %v109_v30  ;;  %233 = vmatpush.msra.mxu2 %v92_v32  ;;  %v56_v49 = vld [vmem:[#allocation5 + $0x18] sm:$0xff]  ;;  %v55_v53 = vld [vmem:[#allocation5 + $0x10] sm:$0xff]  ;;  %v86_v56 = vld [vmem:[#allocation5 + $0x108] sm:$0xff] }
  0x1d   :  { %212 = vmatpush.msra.mxu1 %v77_v31  ;;  %193 = vmatpush.msra.mxu0 %v60_v33  ;;  %v104_v50 = vld [vmem:[#allocation5 + $0x198] sm:$0xff]  ;;  %v103_v54 = vld [vmem:[#allocation5 + $0x190] sm:$0xff]  ;;  %v54_v57 = vld [vmem:[#allocation5 + $0x8] sm:$0xff] }
  0x1e   :  { %253 = vmatpush.msra.mxu3 %v108_v34  ;;  %234 = vmatpush.msra.mxu2 %v91_v36  ;;  %v72_v51 = vld [vmem:[#allocation5 + $0x98] sm:$0xff]  ;;  %v71_v55 = vld [vmem:[#allocation5 + $0x90] sm:$0xff]  ;;  %v102_v58 = vld [vmem:[#allocation5 + $0x188] sm:$0xff] }
  0x1f   :  { %213 = vmatpush.msra.mxu1 %v76_v35  ;;  %194 = vmatpush.msra.mxu0 %v59_v37  ;;  %v70_v59 = vld [vmem:[#allocation5 + $0x88] sm:$0xff]  ;;  %v85_v60 = vld [vmem:[#allocation5 + $0x100] sm:$0xff]  ;;  %v164_v62 = vld [vmem:[#allocation5 + $0x378] sm:$0xff] }
  0x20   :  { %254 = vmatpush.msra.mxu3 %v107_v38  ;;  %235 = vmatpush.msra.mxu2 %v90_v40  ;;  %v53_v61 = vld [vmem:[#allocation5] sm:$0xff]  ;;  %v132_v0 = vld [vmem:[#allocation5 + $0x278] sm:$0xff]  ;;  %v163_v2 = vld [vmem:[#allocation5 + $0x370] sm:$0xff] }
  0x21   :  { %214 = vmatpush.msra.mxu1 %v75_v39  ;;  %195 = vmatpush.msra.mxu0 %v58_v41  ;;  %v101_v63 = vld [vmem:[#allocation5 + $0x180] sm:$0xff]  ;;  %v180_v1 = vld [vmem:[#allocation5 + $0x3f8] sm:$0xff]  ;;  %v131_v4 = vld [vmem:[#allocation5 + $0x270] sm:$0xff] }
  0x22   :  { %255 = vmatpush.msra.mxu3 %v106_v42  ;;  %236 = vmatpush.msra.mxu2 %v89_v44  ;;  %v69_v3 = vld [vmem:[#allocation5 + $0x80] sm:$0xff]  ;;  %v148_v5 = vld [vmem:[#allocation5 + $0x2f8] sm:$0xff]  ;;  %v162_v6 = vld [vmem:[#allocation5 + $0x368] sm:$0xff] }
  0x23   :  { %215 = vmatpush.msra.mxu1 %v74_v43  ;;  %196 = vmatpush.msra.mxu0 %v57_v45  ;;  %v179_v7 = vld [vmem:[#allocation5 + $0x3f0] sm:$0xff]  ;;  %v130_v8 = vld [vmem:[#allocation5 + $0x268] sm:$0xff]  ;;  %v161_v10 = vld [vmem:[#allocation5 + $0x360] sm:$0xff] }
  0x24   :  { %256 = vmatpush.msra.mxu3 %v105_v46  ;;  %237 = vmatpush.msra.mxu2 %v88_v48  ;;  %v147_v9 = vld [vmem:[#allocation5 + $0x2f0] sm:$0xff]  ;;  %v178_v11 = vld [vmem:[#allocation5 + $0x3e8] sm:$0xff]  ;;  %v129_v12 = vld [vmem:[#allocation5 + $0x260] sm:$0xff] }
  0x25   :  { %216 = vmatpush.msra.mxu1 %v73_v47  ;;  %197 = vmatpush.msra.mxu0 %v56_v49  ;;  %v146_v13 = vld [vmem:[#allocation5 + $0x2e8] sm:$0xff]  ;;  %v160_v14 = vld [vmem:[#allocation5 + $0x358] sm:$0xff]  ;;  %v177_v15 = vld [vmem:[#allocation5 + $0x3e0] sm:$0xff] }
  0x26   :  { %257 = vmatpush.msra.mxu3 %v104_v50  ;;  %238 = vmatpush.msra.mxu2 %v87_v52  ;;  %v128_v16 = vld [vmem:[#allocation5 + $0x258] sm:$0xff]  ;;  %v145_v17 = vld [vmem:[#allocation5 + $0x2e0] sm:$0xff]  ;;  %v159_v18 = vld [vmem:[#allocation5 + $0x350] sm:$0xff] }
  0x27   :  { %217 = vmatpush.msra.mxu1 %v72_v51  ;;  %198 = vmatpush.msra.mxu0 %v55_v53  ;;  %v176_v19 = vld [vmem:[#allocation5 + $0x3d8] sm:$0xff]  ;;  %v127_v20 = vld [vmem:[#allocation5 + $0x250] sm:$0xff]  ;;  %v158_v22 = vld [vmem:[#allocation5 + $0x348] sm:$0xff] }
  0x28   :  { %258 = vmatpush.msra.mxu3 %v103_v54  ;;  %239 = vmatpush.msra.mxu2 %v86_v56  ;;  %v144_v21 = vld [vmem:[#allocation5 + $0x2d8] sm:$0xff]  ;;  %v175_v23 = vld [vmem:[#allocation5 + $0x3d0] sm:$0xff]  ;;  %v126_v24 = vld [vmem:[#allocation5 + $0x248] sm:$0xff] }
  0x29   :  { %218 = vmatpush.msra.mxu1 %v71_v55  ;;  %199 = vmatpush.msra.mxu0 %v54_v57  ;;  %v143_v25 = vld [vmem:[#allocation5 + $0x2d0] sm:$0xff]  ;;  %v157_v26 = vld [vmem:[#allocation5 + $0x340] sm:$0xff]  ;;  %v174_v27 = vld [vmem:[#allocation5 + $0x3c8] sm:$0xff] }
  0x2a   :  { %259 = vmatpush.msra.mxu3 %v102_v58  ;;  %240 = vmatpush.msra.mxu2 %v85_v60  ;;  %v125_v28 = vld [vmem:[#allocation5 + $0x240] sm:$0xff]  ;;  %v142_v29 = vld [vmem:[#allocation5 + $0x2c8] sm:$0xff]  ;;  %v156_v30 = vld [vmem:[#allocation5 + $0x338] sm:$0xff] }
  0x2b   :  { %219 = vmatpush.msra.mxu1 %v70_v59  ;;  %200 = vmatpush.msra.mxu0 %v53_v61  ;;  %v173_v31 = vld [vmem:[#allocation5 + $0x3c0] sm:$0xff]  ;;  %v124_v32 = vld [vmem:[#allocation5 + $0x238] sm:$0xff]  ;;  %v155_v34 = vld [vmem:[#allocation5 + $0x330] sm:$0xff] }
  0x2c   :  { %305 = vmatpush.msrb.mxu2 %v164_v62  ;;  %260 = vmatpush.msra.mxu3 %v101_v63  ;;  %v141_v33 = vld [vmem:[#allocation5 + $0x2c0] sm:$0xff]  ;;  %v172_v35 = vld [vmem:[#allocation5 + $0x3b8] sm:$0xff]  ;;  %v123_v36 = vld [vmem:[#allocation5 + $0x230] sm:$0xff] }
  0x2d   :  { %265 = vmatpush.msrb.mxu0 %v132_v0  ;;  %220 = vmatpush.msra.mxu1 %v69_v3  ;;  %v140_v37 = vld [vmem:[#allocation5 + $0x2b8] sm:$0xff]  ;;  %v154_v38 = vld [vmem:[#allocation5 + $0x328] sm:$0xff]  ;;  %v171_v39 = vld [vmem:[#allocation5 + $0x3b0] sm:$0xff] }
  0x2e   :  { %325 = vmatpush.msrb.mxu3 %v180_v1  ;;  %306 = vmatpush.msrb.mxu2 %v163_v2  ;;  %v122_v40 = vld [vmem:[#allocation5 + $0x228] sm:$0xff]  ;;  %v139_v41 = vld [vmem:[#allocation5 + $0x2b0] sm:$0xff]  ;;  %v153_v42 = vld [vmem:[#allocation5 + $0x320] sm:$0xff] }
  0x2f   :  { %266 = vmatpush.msrb.mxu0 %v131_v4  ;;  %285 = vmatpush.msrb.mxu1 %v148_v5  ;;  %v170_v43 = vld [vmem:[#allocation5 + $0x3a8] sm:$0xff]  ;;  %v47_v44 = vld [vmem:[#allocation2 + $0x10] sm:$0xff]  ;;  %v121_v45 = vld [vmem:[#allocation5 + $0x220] sm:$0xff] }
  0x30   :  { %307 = vmatpush.msrb.mxu2 %v162_v6  ;;  %326 = vmatpush.msrb.mxu3 %v179_v7  ;;  %v138_v46 = vld [vmem:[#allocation5 + $0x2a8] sm:$0xff]  ;;  %v152_v47 = vld [vmem:[#allocation5 + $0x318] sm:$0xff]  ;;  %v169_v48 = vld [vmem:[#allocation5 + $0x3a0] sm:$0xff] }
  0x31   :  { %267 = vmatpush.msrb.mxu0 %v130_v8  ;;  %286 = vmatpush.msrb.mxu1 %v147_v9  ;;  %v45_v49 = vld [vmem:[#allocation2] sm:$0xff]  ;;  %v48_v50 = vld [vmem:[#allocation2 + $0x18] sm:$0xff]  ;;  %v151_v53 = vld [vmem:[#allocation5 + $0x310] sm:$0xff] }
  0x32   :  { %308 = vmatpush.msrb.mxu2 %v161_v10  ;;  %327 = vmatpush.msrb.mxu3 %v178_v11  ;;  %v120_v51 = vld [vmem:[#allocation5 + $0x218] sm:$0xff]  ;;  %v137_v52 = vld [vmem:[#allocation5 + $0x2a0] sm:$0xff]  ;;  %v46_v55 = vld [vmem:[#allocation2 + $0x8] sm:$0xff] }
  0x33   :  { %268 = vmatpush.msrb.mxu0 %v129_v12  ;;  %287 = vmatpush.msrb.mxu1 %v146_v13  ;;  %v168_v54 = vld [vmem:[#allocation5 + $0x398] sm:$0xff]  ;;  %v119_v56 = vld [vmem:[#allocation5 + $0x210] sm:$0xff]  ;;  %v150_v58 = vld [vmem:[#allocation5 + $0x308] sm:$0xff] }
  0x34   :  { %309 = vmatpush.msrb.mxu2 %v160_v14  ;;  %328 = vmatpush.msrb.mxu3 %v177_v15  ;;  %v136_v57 = vld [vmem:[#allocation5 + $0x298] sm:$0xff]  ;;  %v167_v59 = vld [vmem:[#allocation5 + $0x390] sm:$0xff]  ;;  %v118_v60 = vld [vmem:[#allocation5 + $0x208] sm:$0xff] }
  0x35   :  { %269 = vmatpush.msrb.mxu0 %v128_v16  ;;  %288 = vmatpush.msrb.mxu1 %v145_v17  ;;  %v135_v61 = vld [vmem:[#allocation5 + $0x290] sm:$0xff]  ;;  %v149_v62 = vld [vmem:[#allocation5 + $0x300] sm:$0xff]  ;;  %v166_v63 = vld [vmem:[#allocation5 + $0x388] sm:$0xff] }
  0x36   :  { %310 = vmatpush.msrb.mxu2 %v159_v18  ;;  %329 = vmatpush.msrb.mxu3 %v176_v19  ;;  %v51_v0 = vld [vmem:[#allocation2 + $0x30] sm:$0xff]  ;;  %v117_v1 = vld [vmem:[#allocation5 + $0x200] sm:$0xff]  ;;  %v134_v2 = vld [vmem:[#allocation5 + $0x288] sm:$0xff] }
  0x37   :  { %270 = vmatpush.msrb.mxu0 %v127_v20  ;;  %289 = vmatpush.msrb.mxu1 %v144_v21  ;;  %v165_v3 = vld [vmem:[#allocation5 + $0x380] sm:$0xff]  ;;  %v52_v5 = vld [vmem:[#allocation2 + $0x38] sm:$0xff]  ;;  %v50_v7 = vld [vmem:[#allocation2 + $0x28] sm:$0xff] }
  0x38   :  { %311 = vmatpush.msrb.mxu2 %v158_v22  ;;  %330 = vmatpush.msrb.mxu3 %v175_v23  ;;  %v49_v4 = vld [vmem:[#allocation2 + $0x20] sm:$0xff] }
  0x39   :  { %271 = vmatpush.msrb.mxu0 %v126_v24  ;;  %290 = vmatpush.msrb.mxu1 %v143_v25  ;;  %v133_v6 = vld [vmem:[#allocation5 + $0x280] sm:$0xff] }
  0x3a   :  { %312 = vmatpush.msrb.mxu2 %v157_v26  ;;  %331 = vmatpush.msrb.mxu3 %v174_v27  ;;  %v384_v8 = vld [vmem:[%s504_s2] ss:$0 sm:$0xff]  ;;  %s469_s2 = smov [#allocation7]  }
  0x3b   :  { %272 = vmatpush.msrb.mxu0 %v125_v28  ;;  %291 = vmatpush.msrb.mxu1 %v142_v29  ;;  %s366_s24 = sshll.u32 %s469_s2, 4  ;;  %s367_s24 = int_to_ptr.vmem [resolvable:$true] %s366_s24 }
  0x3c   :  { %313 = vmatpush.msrb.mxu2 %v156_v30  ;;  %332 = vmatpush.msrb.mxu3 %v173_v31 }
  0x3d   :  { %273 = vmatpush.msrb.mxu0 %v124_v32  ;;  %292 = vmatpush.msrb.mxu1 %v141_v33 }
  0x3e   :  { %314 = vmatpush.msrb.mxu2 %v155_v34  ;;  %333 = vmatpush.msrb.mxu3 %v172_v35 }
  0x3f   :  { %274 = vmatpush.msrb.mxu0 %v123_v36  ;;  %293 = vmatpush.msrb.mxu1 %v140_v37 }
  0x40   :  { %315 = vmatpush.msrb.mxu2 %v154_v38  ;;  %334 = vmatpush.msrb.mxu3 %v171_v39 }
  0x41   :  { %275 = vmatpush.msrb.mxu0 %v122_v40  ;;  %294 = vmatpush.msrb.mxu1 %v139_v41 }
  0x42   :  { %316 = vmatpush.msrb.mxu2 %v153_v42  ;;  %335 = vmatpush.msrb.mxu3 %v170_v43 }
  0x43   :  { %241 = vmatmul.f32.vlgmr.msra.gmra.mxu2 %v47_v44  ;;  %276 = vmatpush.msrb.mxu0 %v121_v45 }
  0x44   :  { %295 = vmatpush.msrb.mxu1 %v138_v46  ;;  %317 = vmatpush.msrb.mxu2 %v152_v47 }
  0x45   :  { %336 = vmatpush.msrb.mxu3 %v169_v48  ;;  %201 = vmatmul.f32.vlgmr.msra.gmra.mxu0 %v45_v49 }
  0x46   :  { %261 = vmatmul.f32.vlgmr.msra.gmra.mxu3 %v48_v50  ;;  %277 = vmatpush.msrb.mxu0 %v120_v51 }
  0x47   :  { %296 = vmatpush.msrb.mxu1 %v137_v52  ;;  %318 = vmatpush.msrb.mxu2 %v151_v53 }
  0x48   :  { %337 = vmatpush.msrb.mxu3 %v168_v54  ;;  %221 = vmatmul.f32.vlgmr.msra.gmra.mxu1 %v46_v55 }
  0x49   :  { %278 = vmatpush.msrb.mxu0 %v119_v56  ;;  %297 = vmatpush.msrb.mxu1 %v136_v57 }
  0x4a   :  { %319 = vmatpush.msrb.mxu2 %v150_v58  ;;  %338 = vmatpush.msrb.mxu3 %v167_v59 }
  0x4b   :  { %279 = vmatpush.msrb.mxu0 %v118_v60  ;;  %298 = vmatpush.msrb.mxu1 %v135_v61 }
  0x4c   :  { %320 = vmatpush.msrb.mxu2 %v149_v62  ;;  %339 = vmatpush.msrb.mxu3 %v166_v63 }
  0x4d   :  { %321 = vmatmul.f32.vlgmr.msrb.gmra.mxu2 %v51_v0  ;;  %280 = vmatpush.msrb.mxu0 %v117_v1 }
  0x4e   :  { %299 = vmatpush.msrb.mxu1 %v134_v2  ;;  %340 = vmatpush.msrb.mxu3 %v165_v3 }
  0x4f   :  { %281 = vmatmul.f32.vlgmr.msrb.gmra.mxu0 %v49_v4  ;;  %341 = vmatmul.f32.vlgmr.msrb.gmra.mxu3 %v52_v5 }
  0x50   :  { %300 = vmatpush.msrb.mxu1 %v133_v6 }
  0x51   :  { %301 = vmatmul.f32.vlgmr.msrb.gmra.mxu1 %v50_v7 }
  0xc2   :  { %v202_v9 = vpop.f32.mrf.mxu0 }
  0xc3   :  { %v203_v10 = vadd.f32 %v384_v8, %v202_v9 }
  0xc5   :  { %v222_v11 = vpop.f32.mrf.mxu1 }
  0xc6   :  { %v223_v12 = vadd.f32 %v222_v11, %v203_v10  ;;  %v242_v13 = vpop.f32.mrf.mxu2 }
  0xc8   :  { %v243_v14 = vadd.f32 %v242_v13, %v223_v12 }
  0xc9   :  { %v262_v15 = vpop.f32.mrf.mxu3 }
  0xca   :  { %v263_v16 = vadd.f32 %v262_v15, %v243_v14 }
  0xcc   :  { %v282_v17 = vpop.f32.mrf.mxu0 }
  0xcd   :  { %v283_v18 = vadd.f32 %v282_v17, %v263_v16 }
  0xce   :  { %v302_v19 = vpop.f32.mrf.mxu1 }
  0xcf   :  { %v303_v20 = vadd.f32 %v302_v19, %v283_v18 }
  0xd0   :  { %v322_v21 = vpop.f32.mrf.mxu2 }
  0xd1   :  { %v323_v22 = vadd.f32 %v322_v21, %v303_v20 }
  0xd2   :  { %v342_v23 = vpop.f32.mrf.mxu3 }
  0xd3   :  { %v343_v24 = vadd.f32 %v342_v23, %v323_v22 }
  0xd5   :  { %v345_v25 = vmul.f32 %v343_v24, %v343_v24 }
  0xd7   :  { %346 = vadd.xlane.f32.xlu0 %v345_v25 }
 0x14a   :  { %v347_v26 = vpop.xlane.xlu0 %346 }
 0x14b   :  { %v348_v27 = vadd.f32 1e-12, %v347_v26 }
 0x14d   :  { %385 = vrsqrt.f32 %v348_v27  ;;  %vm355_vm1 = vweird.f32 %v348_v27 }
 0x153   :  { %v386_v28 = vpop.eup %385 }
 0x154   :  { %v350_v29 = vmul.f32 %v386_v28, %v348_v27  ;;  %vm356_vm0 = vweird.f32 %v386_v28 }
 0x155   :  { %vm357_vm2 = vmor %vm355_vm1, %vm356_vm0 }
 0x156   :  { %v351_v30 = vmul.f32 %v386_v28, %v350_v29 }
 0x158   :  { %v352_v31 = vmul.f32 0.5, %v351_v30 }
 0x15a   :  { %v353_v32 = vsub.f32 1.5, %v352_v31 }
 0x15c   :  { %v354_v33 = vmul.f32 %v386_v28, %v353_v32 }
 0x15e   :  { %v358_v34 = vsel %vm357_vm2, %v386_v28, %v354_v33 }
 0x15f   :  { %v359_v35 = vmul.f32 %v358_v34, %v343_v24 }
 0x161   :  { %360 = vst [vmem:[#allocation7] sm:$0xff] %v359_v35 }
 0x162   :  { %371 = dma.vmem_to_hbm [thread:$0]  %s367_s24, 128, %s369_s27, [#allocation4]  }
 0x163   :  { %463 = dma.done.wait [#allocation4], 128  }
 0x164   :  { %464 = vsyncadd [#allocation4], 4294967168 }
 0x165   :  { %376 = vsyncpa [#allocation3], 1 }
 0x166   :  { %377 = vsyncpa [#allocation6], 1 }
 0x167   :  { %378 = vsyncpa [#allocation4], 1 }

</bundles_post_ra>
